<compile_context>
chip_gen: v6e
topology: v6e:2x2x1
jax: 0.10.0
libtpu: 0.0.40
codegen_flags: <defaults>
</compile_context>

<pallas_src>
import functools

import jax
import jax.numpy as jnp
import numpy as np
from jax.experimental import pallas as pl
from jax.experimental.pallas import tpu as pltpu


def _round_up(x, m):
    return ((x + m - 1) // m) * m


def _tpu_budgets():
    """Generation-aware VMEM budget and per-step HBM-bytes target."""
    try:
        cap = int(pltpu.get_tpu_info().vmem_capacity_bytes)
    except Exception:
        cap = 128 * 2**20
    if cap <= 96 * 2**20:            # v7x-class: 64 MiB VMEM, ~3.2 TB/s HBM
        return 44 * 2**20, 6 * 2**20
    return 100 * 2**20, 4 * 2**20    # v5e / v6e: 128 MiB VMEM


def _pick_tile_l(l_out):
    """Largest lane-dense tile (multiple of 128) with <=25% padding waste."""
    l128 = _round_up(max(l_out, 1), 128)
    for t in (4096, 2048, 1024, 512, 256):
        if t <= l128 and _round_up(l128, t) * 4 <= l128 * 5:
            return t
    return 128


def _pick_batch_fold(B, C_in, C_out, sub, S, tile_l, K, itemsize,
                     step_target, vmem_budget, max_rows_in=64, max_rows_out=256):
    """# batch elements folded per block: fills the packed sublane count, targets
    the per-step HBM budget, stays inside the VMEM budget, and caps rows so the
    block-diagonal MXU matmul and per-chunk vreg live-set stay cheap."""
    cands = [bt for bt in range(1, B + 1)
             if B % bt == 0
             and (bt * C_in) % sub == 0 and (bt * C_out) % sub == 0
             and bt * C_in <= max_rows_in and bt * C_out <= max_rows_out]
    if not cands:
        loose = [bt for bt in range(1, B + 1)
                 if B % bt == 0
                 and (bt * C_in) % sub == 0 and (bt * C_out) % sub == 0]
        # Fallback: block spans full rows (legal; stores may be masked).
        return loose[0] if loose else B

    def step_bytes(bt):
        return (S * bt * C_in * (tile_l + 128) + bt * C_out * tile_l) * itemsize

    def vmem_bytes(bt):
        rin, rout = bt * C_in, bt * C_out
        blocks = (S * rin * (tile_l + 128) + rout * tile_l) * itemsize
        weights = (rin * (K + 1) + rout * (rin + 1)) * 4
        return 2 * (blocks + weights) + S * rin * 256 * itemsize

    best = cands[0]
    for bt in cands:
        if vmem_bytes(bt) > vmem_budget:
            break
        best = bt
        if step_bytes(bt) >= step_target:
            break
    return best


def _sepconv1d_kernel(x_cur_ref, x_halo_ref, wd_ref, bd_ref, wbd_ref, bp_ref,
                      o_ref, edge_ref, *, k_taps, stride, tile_l, rows_in):
    """One (batch-tile, length-tile) grid step.

    x_cur_ref : (S*rows_in, tile_l)   lane-aligned current input window (phase-major)
    x_halo_ref: (S*rows_in, 128)      right halo (next 128-lane block)
    wd_ref    : (rows_in, K)          depthwise taps, tiled over the batch fold
    bd_ref    : (rows_in, 1)          depthwise bias
    wbd_ref   : (rows_out, rows_in)   block-diagonal 1x1 pointwise weight
    bp_ref    : (rows_out, 1)         pointwise bias, tiled over the batch fold
    o_ref     : (rows_out, tile_l)    lane-dense output block
    edge_ref  : (S*rows_in, 256)      scratch: last 128 input lanes + 128-lane halo
    """
    # Stage ONLY the 128-lane edge (replaces the old full-tile staging copy).
    edge_ref[:, :128] = x_cur_ref[:, tile_l - 128:]
    edge_ref[:, 128:] = x_halo_ref[...]

    # Loop-invariant weights, loaded/sliced once (hoisted out of the chunk loop).
    wd = wd_ref[...].astype(jnp.float32)
    taps = [wd[:, k:k + 1] for k in range(k_taps)]
    bd = bd_ref[...].astype(jnp.float32)
    wbd = wbd_ref[...].astype(jnp.float32)
    bp = bp_ref[...].astype(jnp.float32)

    def depthwise(read):
        # Depthwise conv for one 128-lane chunk; read(r, q) -> (rows_in, 128)
        # slice of phase r at lane offset q.
        acc = jnp.zeros((rows_in, 128), jnp.float32)
        for k in range(k_taps):                              # K is small -> unrolled
            r, q = k % stride, k // stride
            acc = acc + read(r, q).astype(jnp.float32) * taps[k]
        return acc + bd

    def emit(col, y):
        # Fused 1x1 pointwise conv: one small MXU matmul per chunk against the
        # block-diagonal weight (MXU is otherwise idle -> free slack).
        z = jnp.dot(wbd, y, preferred_element_type=jnp.float32,
                    precision=jax.lax.Precision.HIGHEST) + bp
        o_ref[:, pl.ds(col, 128)] = z.astype(o_ref.dtype)

    def main_chunk(col):
        emit(col, depthwise(
            lambda r, q: x_cur_ref[r * rows_in:(r + 1) * rows_in,
                                   pl.ds(col + q, 128)]))

    n_main = tile_l // 128 - 1          # chunks whose taps stay inside the block
    if 0 < n_main <= 8:
        for c in range(n_main):          # short tiles: static offsets, fully unrolled
            main_chunk(c * 128)
    elif n_main > 8:
        @pl.loop(0, n_main)              # long tiles: bounded code size / live ranges
        def _(c):
            main_chunk(pl.multiple_of(c * 128, 128))

    # Last 128 lanes: taps cross into the halo -> read from the small edge scratch.
    emit((tile_l // 128 - 1) * 128,
         depthwise(lambda r, q: edge_ref[r * rows_in:(r + 1) * rows_in,
                                         pl.ds(q, 128)]))


def separable_conv1d(x, w_dw, b_dw, w_pw, b_pw, *, kernel_size=3, stride=1):
    """x: (B, C_in, L) -> (B, C_out, L_out); matches nn.Conv1d(groups=C_in,
    padding=kernel_size//2, stride=stride) followed by a 1x1 Conv1d
    (PyTorch parameter shapes)."""
    B, C_in, L = x.shape
    C_out = w_pw.shape[0]
    K, S = int(kernel_size), int(stride)
    pad = K // 2
    L_out = (L + 2 * pad - K) // S + 1
    assert L_out >= 1
    assert (K - 1) // S <= 128, "128-lane halo/phase too small for this K/stride"

    itemsize = jnp.dtype(x.dtype).itemsize
    sub = max(8, 32 // max(itemsize, 1))      # packed sublanes: 8 f32 / 16 bf16 / 32 i8
    vmem_budget, step_target = _tpu_budgets()

    # ---- tiling --------------------------------------------------------------
    tile_l = _pick_tile_l(L_out)
    bt = _pick_batch_fold(B, C_in, C_out, sub, S, tile_l, K, itemsize,
                          step_target, vmem_budget)
    num_b = B // bt
    num_l = -(-L_out // tile_l)
    # v7x has 2 TensorCores: keep >=2 parallel grid iterations when possible.
    while num_b * num_l < 2 and tile_l > 128:
        tile_l //= 2
        num_l = -(-L_out // tile_l)
    l_out_p = num_l * tile_l
    rows_in, rows_out = bt * C_in, bt * C_out

    # ---- host-side staging (layout plumbing only, no conv math) --------------
    # Pad, then deinterleave into `stride` phase planes stacked along rows so
    # depthwise tap k is a contiguous lane load of phase k % S at offset k // S.
    L_phase = num_l * tile_l + 128            # current tiles + one 128-lane halo
    right = S * L_phase - L - pad
    assert right >= 0
    x_pad = jnp.pad(x.reshape(B * C_in, L), ((0, 0), (pad, right)))
    if S == 1:
        x_ph = x_pad
    else:
        x_ph = (x_pad.reshape(num_b, rows_in, L_phase, S)
                     .transpose(0, 3, 1, 2)
                     .reshape(num_b * S * rows_in, L_phase))

    f32 = jnp.float32
    wd = jnp.tile(w_dw.reshape(C_in, K).astype(f32), (bt, 1))       # (rows_in, K)
    bd = jnp.tile(b_dw.reshape(C_in, 1).astype(f32), (bt, 1))       # (rows_in, 1)
    # Block-diagonal 1x1 weight: one MXU matmul mixes channels for the whole fold.
    wbd = jnp.kron(jnp.eye(bt, dtype=f32), w_pw.reshape(C_out, C_in).astype(f32))
    bp = jnp.tile(b_pw.reshape(C_out, 1).astype(f32), (bt, 1))      # (rows_out, 1)

    kernel = functools.partial(_sepconv1d_kernel, k_taps=K, stride=S,
                               tile_l=tile_l, rows_in=rows_in)

    est = (2 * ((S * rows_in * (tile_l + 128) + rows_out * tile_l) * itemsize
                + (rows_in * (K + 1) + rows_out * (rows_in + 1)) * 4)
           + S * rows_in * 256 * itemsize)
    vmem_limit = int(min(vmem_budget, max(2 * est + 8 * 2**20, 24 * 2**20)))

    out_flat = pl.pallas_call(
        kernel,
        out_shape=jax.ShapeDtypeStruct((B * C_out, l_out_p), x.dtype),
        grid_spec=pltpu.PrefetchScalarGridSpec(
            num_scalar_prefetch=0,
            grid=(num_b, num_l),
            in_specs=[
                # current input window (lane-aligned, Blocked)
                pl.BlockSpec((S * rows_in, tile_l), lambda jb, jl: (jb, jl)),
                # right halo: next 128-lane block of the same array
                pl.BlockSpec((S * rows_in, 128),
                             lambda jb, jl: (jb, (jl + 1) * (tile_l // 128))),
                pl.BlockSpec((rows_in, K), lambda jb, jl: (0, 0)),
                pl.BlockSpec((rows_in, 1), lambda jb, jl: (0, 0)),
                pl.BlockSpec((rows_out, rows_in), lambda jb, jl: (0, 0)),
                pl.BlockSpec((rows_out, 1), lambda jb, jl: (0, 0)),
            ],
            out_specs=pl.BlockSpec((rows_out, tile_l), lambda jb, jl: (jb, jl)),
            scratch_shapes=[pltpu.VMEM((S * rows_in, 256), x.dtype)],
        ),
        compiler_params=pltpu.CompilerParams(
            dimension_semantics=("parallel", "parallel"),
            vmem_limit_bytes=vmem_limit),
    )(x_ph, x_ph, wd, bd, wbd, bp)

    out = out_flat.reshape(B, C_out, l_out_p)
    return out[:, :, :L_out] if l_out_p != L_out else out


def _reference(x, w_dw, b_dw, w_pw, b_pw, kernel_size, stride):
    """Pure-jnp, fully elementwise f32 reference (PyTorch Conv1d semantics)."""
    B, C_in, L = x.shape
    C_out = w_pw.shape[0]
    pad = kernel_size // 2
    L_out = (L + 2 * pad - kernel_size) // stride + 1
    xp = jnp.pad(x.astype(jnp.float32), ((0, 0), (0, 0), (pad, pad)))
    wd = w_dw.reshape(C_in, kernel_size).astype(jnp.float32)
    y = jnp.zeros((B, C_in, L_out), jnp.float32)
    for k in range(kernel_size):
        end = k + (L_out - 1) * stride + 1
        y = y + xp[:, :, k:end:stride] * wd[None, :, k, None]
    y = y + b_dw.astype(jnp.float32)[None, :, None]
    wp = w_pw.reshape(C_out, C_in).astype(jnp.float32)
    z = (wp[None, :, :, None] * y[:, None, :, :]).sum(axis=2)
    return z + b_pw.astype(jnp.float32)[None, :, None]


def _check(x, w_dw, b_dw, w_pw, b_pw, K, S):
    out = jax.block_until_ready(
        separable_conv1d(x, w_dw, b_dw, w_pw, b_pw, kernel_size=K, stride=S))
    ref = _reference(x, w_dw, b_dw, w_pw, b_pw, K, S)
    np.testing.assert_allclose(np.asarray(out), np.asarray(ref),
                               rtol=1e-4, atol=1e-5)


if __name__ == "__main__":
    key = jax.random.PRNGKey(0)
    kx, k1, k2, k3, k4, kx2, kx3, kx4 = jax.random.split(key, 8)

    # Shapes consistent with SeparableConv1d(in_channels=4, out_channels=8).
    B, C_in, C_out, L, K = 2, 4, 8, 16, 3
    x = jax.random.normal(kx, (B, C_in, L), dtype=jnp.float32)
    # Parameter shapes mirror nn.Conv1d:
    #   depthwise.weight: (C_in, 1, K), depthwise.bias: (C_in,)
    #   pointwise.weight: (C_out, C_in, 1), pointwise.bias: (C_out,)
    w_dw = 0.1 * jax.random.normal(k1, (C_in, 1, K), dtype=jnp.float32)
    b_dw = 0.1 * jax.random.normal(k2, (C_in,), dtype=jnp.float32)
    w_pw = 0.1 * jax.random.normal(k3, (C_out, C_in, 1), dtype=jnp.float32)
    b_pw = 0.1 * jax.random.normal(k4, (C_out,), dtype=jnp.float32)

    # 1) tiny case (single block)
    _check(x, w_dw, b_dw, w_pw, b_pw, K, 1)

    # 2) stride=2: exercises the host-side phase split (no strided lane loads)
    x2 = jax.random.normal(kx2, (B, C_in, 64), dtype=jnp.float32)
    _check(x2, w_dw, b_dw, w_pw, b_pw, K, 2)

    # 3) multi-tile grid, unrolled chunk path (tile_l=1024, grid 1x2)
    x3 = jax.random.normal(kx3, (4, C_in, 2048), dtype=jnp.float32)
    _check(x3, w_dw, b_dw, w_pw, b_pw, K, 1)

    # 4) long tile, pl.loop chunk path (tile_l=2048, grid 1x2)
    x4 = jax.random.normal(kx4, (4, C_in, 4096), dtype=jnp.float32)
    _check(x4, w_dw, b_dw, w_pw, b_pw, K, 1)

    print("KERNEL_OK")
</pallas_src>

<mosaic_0001>
module attributes {stable_mosaic.version = 11 : i64} {
  func.func @_sepconv1d_kernel(%arg0: i32, %arg1: i32, %arg2: memref<8x128xf32, #tpu.memory_space<vmem>>, %arg3: memref<8x128xf32, #tpu.memory_space<vmem>>, %arg4: memref<8x3xf32, #tpu.memory_space<vmem>>, %arg5: memref<8x1xf32, #tpu.memory_space<vmem>>, %arg6: memref<16x8xf32, #tpu.memory_space<vmem>>, %arg7: memref<16x1xf32, #tpu.memory_space<vmem>>, %arg8: memref<16x128xf32, #tpu.memory_space<vmem>>, %arg9: memref<8x256xf32, #tpu.memory_space<vmem>>) attributes {dimension_semantics = [#tpu.dimension_semantics<parallel>, #tpu.dimension_semantics<parallel>], iteration_bounds = array<i64: 1, 1>, scalar_prefetch = 0 : i64, scratch_operands = 1 : i64, tpu.core_type = #tpu.core_type<tc>, window_params = [{transform_indices = @transform_0, window_bounds = array<i64: 8, 128>}, {transform_indices = @transform_1, window_bounds = array<i64: 8, 128>}, {pipeline_mode = #tpu.pipeline_mode<synchronous>, transform_indices = @transform_2, window_bounds = array<i64: 8, 3>}, {pipeline_mode = #tpu.pipeline_mode<synchronous>, transform_indices = @transform_3, window_bounds = array<i64: 8, 1>}, {pipeline_mode = #tpu.pipeline_mode<synchronous>, transform_indices = @transform_4, window_bounds = array<i64: 16, 8>}, {pipeline_mode = #tpu.pipeline_mode<synchronous>, transform_indices = @transform_5, window_bounds = array<i64: 16, 1>}, {transform_indices = @transform_6, window_bounds = array<i64: 16, 128>}]} {
    %c0 = arith.constant 0 : index
    %c0_0 = arith.constant 0 : index
    %0 = vector.load %arg2[%c0, %c0_0] : memref<8x128xf32, #tpu.memory_space<vmem>>, vector<8x128xf32>
    %c0_1 = arith.constant 0 : index
    %c0_2 = arith.constant 0 : index
    %1 = vector.load %arg9[%c0_1, %c0_2] : memref<8x256xf32, #tpu.memory_space<vmem>>, vector<8x128xf32>
    tpu.vector_store %arg9[%c0_1, %c0_2], %0 {strides = array<i32>} : memref<8x256xf32, #tpu.memory_space<vmem>>, vector<8x128xf32>,
    %c0_3 = arith.constant 0 : index
    %c0_4 = arith.constant 0 : index
    %2 = vector.load %arg3[%c0_3, %c0_4] : memref<8x128xf32, #tpu.memory_space<vmem>>, vector<8x128xf32>
    %c0_5 = arith.constant 0 : index
    %c128 = arith.constant 128 : index
    %3 = vector.load %arg9[%c0_5, %c128] : memref<8x256xf32, #tpu.memory_space<vmem>>, vector<8x128xf32>
    tpu.vector_store %arg9[%c0_5, %c128], %2 {strides = array<i32>} : memref<8x256xf32, #tpu.memory_space<vmem>>, vector<8x128xf32>,
    %c0_6 = arith.constant 0 : index
    %c0_7 = arith.constant 0 : index
    %4 = vector.load %arg4[%c0_6, %c0_7] : memref<8x3xf32, #tpu.memory_space<vmem>>, vector<8x3xf32>
    %5 = vector.extract_strided_slice %4 {offsets = [0, 0], sizes = [8, 1], strides = [1, 1]} : vector<8x3xf32> to vector<8x1xf32>
    %6 = vector.extract_strided_slice %4 {offsets = [0, 1], sizes = [8, 1], strides = [1, 1]} : vector<8x3xf32> to vector<8x1xf32>
    %7 = vector.extract_strided_slice %4 {offsets = [0, 2], sizes = [8, 1], strides = [1, 1]} : vector<8x3xf32> to vector<8x1xf32>
    %c0_8 = arith.constant 0 : index
    %c0_9 = arith.constant 0 : index
    %8 = vector.load %arg5[%c0_8, %c0_9] : memref<8x1xf32, #tpu.memory_space<vmem>>, vector<8x1xf32>
    %c0_10 = arith.constant 0 : index
    %c0_11 = arith.constant 0 : index
    %9 = vector.load %arg6[%c0_10, %c0_11] : memref<16x8xf32, #tpu.memory_space<vmem>>, vector<16x8xf32>
    %c0_12 = arith.constant 0 : index
    %c0_13 = arith.constant 0 : index
    %10 = vector.load %arg7[%c0_12, %c0_13] : memref<16x1xf32, #tpu.memory_space<vmem>>, vector<16x1xf32>
    %cst = arith.constant 0.000000e+00 : f32
    %11 = vector.broadcast %cst : f32 to vector<8x128xf32>
    %c0_14 = arith.constant 0 : index
    %c0_15 = arith.constant 0 : index
    %12 = vector.load %arg9[%c0_14, %c0_15] : memref<8x256xf32, #tpu.memory_space<vmem>>, vector<8x128xf32>
    %13 = vector.broadcast %5 : vector<8x1xf32> to vector<8x128xf32>
    %14 = arith.mulf %12, %13 : vector<8x128xf32>
    %15 = arith.addf %11, %14 : vector<8x128xf32>
    %c0_16 = arith.constant 0 : index
    %c1 = arith.constant 1 : index
    %16 = vector.load %arg9[%c0_16, %c1] : memref<8x256xf32, #tpu.memory_space<vmem>>, vector<8x128xf32>
    %17 = vector.broadcast %6 : vector<8x1xf32> to vector<8x128xf32>
    %18 = arith.mulf %16, %17 : vector<8x128xf32>
    %19 = arith.addf %15, %18 : vector<8x128xf32>
    %c0_17 = arith.constant 0 : index
    %c2 = arith.constant 2 : index
    %20 = vector.load %arg9[%c0_17, %c2] : memref<8x256xf32, #tpu.memory_space<vmem>>, vector<8x128xf32>
    %21 = vector.broadcast %7 : vector<8x1xf32> to vector<8x128xf32>
    %22 = arith.mulf %20, %21 : vector<8x128xf32>
    %23 = arith.addf %19, %22 : vector<8x128xf32>
    %24 = vector.broadcast %8 : vector<8x1xf32> to vector<8x128xf32>
    %25 = arith.addf %23, %24 : vector<8x128xf32>
    %cst_18 = arith.constant dense<0.000000e+00> : vector<16x128xf32>
    %26 = tpu.matmul %9, %25, %cst_18 {dimension_numbers = #tpu.dot_dimension_numbers<[1], [0], [0], [1], [0, 0, 1, 1], [], []>, precision = #tpu.contract_precision<fp32>} : vector<16x8xf32>, vector<8x128xf32>, vector<16x128xf32> -> vector<16x128xf32>
    %27 = vector.broadcast %10 : vector<16x1xf32> to vector<16x128xf32>
    %28 = arith.addf %26, %27 : vector<16x128xf32>
    %c0_19 = arith.constant 0 : index
    %c0_20 = arith.constant 0 : index
    %29 = vector.load %arg8[%c0_19, %c0_20] : memref<16x128xf32, #tpu.memory_space<vmem>>, vector<16x128xf32>
    tpu.vector_store %arg8[%c0_19, %c0_20], %28 {strides = array<i32>} : memref<16x128xf32, #tpu.memory_space<vmem>>, vector<16x128xf32>,
    return
  }
  func.func @transform_0(%arg0: i32, %arg1: i32) -> (i32, i32) {
    %c0_i32 = arith.constant 0 : i32
    return %arg0, %arg1 : i32, i32
  }
  func.func @transform_1(%arg0: i32, %arg1: i32) -> (i32, i32) {
    %c1_i32 = arith.constant 1 : i32
    %0 = arith.addi %arg1, %c1_i32 : i32
    %c1_i32_0 = arith.constant 1 : i32
    %1 = arith.muli %0, %c1_i32_0 : i32
    %c0_i32 = arith.constant 0 : i32
    return %arg0, %1 : i32, i32
  }
  func.func @transform_2(%arg0: i32, %arg1: i32) -> (i32, i32) {
    %c0_i32 = arith.constant 0 : i32
    %c0_i32_0 = arith.constant 0 : i32
    %c0_i32_1 = arith.constant 0 : i32
    return %c0_i32, %c0_i32_0 : i32, i32
  }
  func.func @transform_3(%arg0: i32, %arg1: i32) -> (i32, i32) {
    %c0_i32 = arith.constant 0 : i32
    %c0_i32_0 = arith.constant 0 : i32
    %c0_i32_1 = arith.constant 0 : i32
    return %c0_i32, %c0_i32_0 : i32, i32
  }
  func.func @transform_4(%arg0: i32, %arg1: i32) -> (i32, i32) {
    %c0_i32 = arith.constant 0 : i32
    %c0_i32_0 = arith.constant 0 : i32
    %c0_i32_1 = arith.constant 0 : i32
    return %c0_i32, %c0_i32_0 : i32, i32
  }
  func.func @transform_5(%arg0: i32, %arg1: i32) -> (i32, i32) {
    %c0_i32 = arith.constant 0 : i32
    %c0_i32_0 = arith.constant 0 : i32
    %c0_i32_1 = arith.constant 0 : i32
    return %c0_i32, %c0_i32_0 : i32, i32
  }
  func.func @transform_6(%arg0: i32, %arg1: i32) -> (i32, i32) {
    %c0_i32 = arith.constant 0 : i32
    return %arg0, %arg1 : i32, i32
  }
}

</mosaic_0001>

<bundles_post_ra>
// kernel: tpu_custom_call.1
= control target key start
LH: loop header
LB: loop body
LE: loop exit
PB: predicated region body
PF: predicated region fallthrough
CT: control target
= control target key end

     0   :  { %v712_v1 = vmov 1   ;;  %v713_v2 = vmov 0   ;;  %s790_s0 = inlined_call_operand.vmem [shape: f32[8,256], index: 0, kind: input, shape index: {}]   ;;  %s791_s1 = inlined_call_operand.vmem [shape: f32[8,256], index: 1, kind: input, shape index: {}]   ;;  %s792_s2 = inlined_call_operand.vmem [shape: f32[8,3], index: 2, kind: input, shape index: {}]   ;;  %s793_s3 = inlined_call_operand.vmem [shape: f32[8,1], index: 3, kind: input, shape index: {}]   ;;  %s794_s4 = inlined_call_operand.vmem [shape: f32[16,8], index: 4, kind: input, shape index: {}]   ;;  %s795_s5 = inlined_call_operand.vmem [shape: f32[16,1], index: 5, kind: input, shape index: {}]   ;;  %s796_s6 = inlined_call_operand.hbm [shape: f32[16,128], index: 6, kind: output, shape index: {}]  }
   0x1   :  { %v45_v0 = vld [vmem:[%s792_s2] sm:$0xff]  ;;  %686 = vset.pattern.permute.xlu0 %v712_v1  ;;  %688 = vset.pattern.permute.xlu1 %v713_v2 }
   0x2   :  { %11 = vsyncpa [#allocation4], 0  ;;  %62 = vperm.xlu0 %686, %v45_v0   ;;  %54 = vperm.xlu1 %688, %v45_v0   ;;  %v714_v3 = vmov 2   ;;  %v46_v4 = vld [vmem:[%s793_s3] sm:$0xff]  ;;  %vm109_vm0 = vcmask 64512   ;;  %v629_v12 = vld [vmem:[%s791_s1 + $0x8] sm:$0xff] }
   0x3   :  { %v49_v5 = vld [vmem:[%s795_s5] sm:$0xff]  ;;  %s716_s7 = smov 126   ;;  %v50_v21 = vld [vmem:[%s795_s5 + $0x8] sm:$0xff]  ;;  %vm73_vm1 = vcmask 1039360   ;;  %vm89_vm2 = vcmask 1031168  }
   0x4   :  { %v41_v6 = vld [vmem:[%s790_s0] sm:$0xff]  ;;  %s715_s0 = smov 127   ;;  %v48_v23 = vld [vmem:[%s794_s4 + $0x8] sm:$0xff] }
   0x5   :  { %v47_v7 = vld [vmem:[%s794_s4] sm:$0xff]  ;;  %v114_v24 = vsel %vm109_vm0, %v48_v23, 0  ;;  %s717_s4 = smov [#allocation3]  }
   0x6   :  { %687 = vset.pattern.permute.xlu0 %v714_v3  ;;  %v111_v8 = vsel %vm109_vm0, %v47_v7, 0  ;;  %v192_v26 = vand.u32 4294901760, %v114_v24  ;;  %s612_s5 = sshll.u32 %s717_s4, 4  ;;  %s613_s5 = int_to_ptr.vmem [resolvable:$true] %s612_s5 }
   0x7   :  { %78 = vperm.xlu0 %687, %v45_v0   ;;  %v771_v10 = vand.u32 4294901760, %v111_v8  ;;  %s690_s11 = scalar_lea.vmem %s613_s5, 256  ;;  %p695_p1 = scmp.lt.s32.totalorder %s613_s5, %s613_s5 }
   0x8   :  { %v193_v28 = vsub.f32 %v114_v24, %v192_v26  ;;  %p691_p0 = scmp.ne.s32.totalorder %s613_s5, %s690_s11  ;;  %p696_p2 = scmp.lt.s32.totalorder %s690_s11, %s690_s11 }
   0x9   :  { %v183_v13 = vsub.f32 %v111_v8, %v771_v10  ;;  %655 = vmatprep.mubr.f32.mxu1 %v771_v10 }
   0xa   :  { %v194_v32 = vand.u32 4294901760, %v193_v28  ;;  %p697_p3 = por %p696_p2, %p695_p1 }
   0xb   :  { %689 = vset.pattern.permute.xlu0 %v713_v2  ;;  %v184_v14 = vand.u32 4294901760, %v183_v13 }
   0xc   :  { %95 = vperm.xlu0 %689, %v46_v4   ;;  %v195_v37 = vsub.f32 %v193_v28, %v194_v32  ;;  %p698_p4 = pnand %p697_p3, %p691_p0 }
   0xd   :  { %v185_v17 = vsub.f32 %v183_v13, %v184_v14 }
   0xe   :  { %v196_v41 = vand.u32 4294901760, %v195_v37 }
   0xf   :  { %v186_v19 = vand.u32 4294901760, %v185_v17 }
  0x10   :  { %101 = vperm.xlu0 %689, %v49_v5  }
  0x11   :  { %650 = vmatprep.mubr.f32.mxu0 %v186_v19 }
  0x7d   :  { %v63_v9 = vpop.permute.xlu0 %62  ;;  %v55_v22 = vpop.permute.xlu1 %54 }
  0x7e   :  { %v65_v11 = vmul.f32 %v63_v9, %v41_v6  ;;  %v66_v15 = vmul.f32 %v629_v12, %v63_v9  ;;  %v57_v31 = vmul.f32 %v55_v22, %v41_v6 }
  0x80   :  { %69 = vrot.lane.b32.xlu1 %v65_v11, %s715_s0 }
  0x82   :  { %v79_v16 = vpop.permute.xlu0 %78 }
  0x83   :  { %v81_v18 = vmul.f32 %v79_v16, %v41_v6  ;;  %v82_v20 = vmul.f32 %v629_v12, %v79_v16 }
  0x84   :  { %71 = vrot.lane.b32.xlu1 %v66_v15, %s715_s0 }
  0x87   :  { %v96_v38 = vpop.permute.xlu0 %95 }
  0x88   :  { %85 = vrot.lane.b32.xlu1 %v81_v18, %s716_s7 }
  0x8b   :  { %v102_v50 = vpop.permute.xlu0 %101 }
  0x8c   :  { %87 = vrot.lane.b32.xlu1 %v82_v20, %s716_s7 }
  0x90   :  { %106 = vperm.xlu1 %688, %v50_v21  }
  0xf2   :  { %v70_v25 = vpop.permute.xlu1 %69 }
  0xf6   :  { %v72_v27 = vpop.permute.xlu1 %71 }
  0xf7   :  { %v74_v30 = vsel %vm73_vm1, %v70_v25, %v72_v27 }
  0xf8   :  { %v76_v33 = vadd.f32 %v74_v30, %v57_v31 }
  0xfa   :  { %v86_v29 = vpop.permute.xlu1 %85 }
  0xfe   :  { %v88_v34 = vpop.permute.xlu1 %87 }
  0xff   :  { %v90_v35 = vsel %vm89_vm2, %v86_v29, %v88_v34 }
 0x100   :  { %v92_v36 = vadd.f32 %v90_v35, %v76_v33 }
 0x102   :  { %v98_v39 = vadd.f32 %v96_v38, %v92_v36 }
 0x104   :  { %v147_v40 = vand.u32 4294901760, %v98_v39 }
 0x106   :  { %v234_v42 = vsub.f32 %v98_v39, %v147_v40  ;;  %648 = vmatprep.subr.mxu0 %v147_v40 }
 0x107   :  { %649 = vmatpush3.msra.mxu0 %v147_v40 }
 0x108   :  { %651 = vmatmul.mubr.f32.vlgmr.msra.gmra.mxu0 %v196_v41  ;;  %658 = vmatprep.subr.mxu0 %v234_v42  ;;  %v235_v43 = vand.u32 4294901760, %v234_v42 }
 0x109   :  { %659 = vmatpush3.msra.mxu0 %v234_v42  ;;  %660 = vmatprep.mubr.f32.mxu0 %v183_v13 }
 0x10a   :  { %668 = vmatprep.subr.mxu0 %v235_v43  ;;  %v236_v44 = vsub.f32 %v234_v42, %v235_v43 }
 0x10b   :  { %v107_v49 = vpop.permute.xlu1 %106 }
 0x10c   :  { %661 = vmatmul.mubr.f32.vlgmr.msra.gmra.mxu0 %v193_v28  ;;  %v237_v45 = vand.u32 4294901760, %v236_v44 }
 0x10d   :  { %669 = vmatpush3.msra.mxu0 %v235_v43  ;;  %670 = vmatprep.mubr.f32.mxu0 %v771_v10 }
 0x10e   :  { %653 = vmatprep.subr.mxu1 %v237_v45 }
 0x10f   :  { %654 = vmatpush3.msra.mxu1 %v237_v45 }
 0x110   :  { %656 = vmatmul.mubr.f32.vlgmr.msra.gmra.mxu1 %v192_v26  ;;  %663 = vmatprep.subr.mxu1 %v147_v40 }
 0x111   :  { %664 = vmatpush3.msra.mxu1 %v147_v40  ;;  %665 = vmatprep.mubr.f32.mxu1 %v184_v14 }
 0x112   :  { %673 = vmatprep.subr.mxu1 %v147_v40  ;;  %671 = vmatmul.mubr.f32.vlgmr.msra.gmra.mxu0 %v192_v26 }
 0x114   :  { %666 = vmatmul.mubr.f32.vlgmr.msra.gmra.mxu1 %v194_v32 }
 0x115   :  { %674 = vmatpush3.msra.mxu1 %v147_v40  ;;  %675 = vmatprep.mubr.f32.mxu1 %v771_v10 }
 0x118   :  { %676 = vmatmul.mubr.f32.vlgmr.msra.gmra.mxu1 %v192_v26 }
 0x1c8   :  { %v652_v46 = vpop.f32.mrf.mxu0 }
 0x1c9   :  { %v199_v51 = vadd.f32 %v652_v46, %v107_v49 }
 0x1ca   :  { %v188_v47 = vpop.f32.mrf.mxu0 }
 0x1cb   :  { %v189_v54 = vadd.f32 %v188_v47, %v102_v50 }
 0x1cc   :  { %v662_v48 = vpop.f32.mrf.mxu0 }
 0x1ce   :  { %v354_v53 = vpop.f32.mrf.mxu0 }
 0x1d0   :  { %v657_v52 = vpop.f32.mrf.mxu1 }
 0x1d1   :  { %v281_v55 = vadd.f32 %v657_v52, %v199_v51 }
 0x1d2   :  { %v274_v56 = vpop.f32.mrf.mxu1  ;;  %v672_v60 = vpop.f32.mrf.mxu0 }
 0x1d3   :  { %v362_v57 = vadd.f32 %v662_v48, %v281_v55  ;;  %v275_v58 = vadd.f32 %v274_v56, %v189_v54 }
 0x1d4   :  { %v667_v59 = vpop.f32.mrf.mxu1  ;;  %v517_v2 = vpop.f32.mrf.mxu0 }
 0x1d5   :  { %v355_v61 = vadd.f32 %v354_v53, %v275_v58  ;;  %v444_v62 = vadd.f32 %v667_v59, %v362_v57 }
 0x1d6   :  { %v435_v63 = vpop.f32.mrf.mxu1 }
 0x1d7   :  { %v524_v0 = vadd.f32 %v672_v60, %v444_v62  ;;  %v436_v1 = vadd.f32 %v435_v63, %v355_v61 }
 0x1d8   :  { %v677_v3 = vpop.f32.mrf.mxu1 }
 0x1d9   :  { %v518_v4 = vadd.f32 %v517_v2, %v436_v1  ;;  %v602_v5 = vadd.f32 %v677_v3, %v524_v0 }
 0x1da   :  { %v595_v6 = vpop.f32.mrf.mxu1 }
 0x1db   :  { %606 = vst [vmem:[#allocation3 + $0x8] sm:$0xff] %v602_v5  ;;  %v596_v7 = vadd.f32 %v595_v6, %v518_v4 }
 0x1dd   :  { %605 = vst [vmem:[#allocation3] sm:$0xff] %v596_v7 }
 0x1de   :  { %701 = shalt.err (!%p698_p4)
}
 0x1df   :  { %s718_s12 = smov 128   ;;  %s719_s13 = smov 8  }
 0x1e0   :  { %618 = dma.vmem_to_hbm [thread:$0]  %s613_s5, 256, %s796_s6, [#allocation4], %s718_s12, %s718_s12, %s719_s13  }
 0x1e1   :  { %710 = dma.done.wait [#allocation4], 256  }
 0x1e2   :  { %711 = vsyncadd [#allocation4], 4294967040 }
 0x1e3   :  { %622 = vsyncpa [#allocation4], 1 }

</bundles_post_ra>
